<compile_context>
chip_gen: v6e
topology: v6e:2x2x1
jax: 0.10.0
libtpu: 0.0.40
codegen_flags: <defaults>
</compile_context>

<pallas_src>
import functools

import jax
import jax.numpy as jnp
from jax.experimental import pallas as pl
from jax.experimental.pallas import tpu as pltpu


def _round_up(x: int, m: int) -> int:
    return (x + m - 1) // m * m


def _mlp_kernel(x_ref, w1_ref, b1_ref, w2_ref, b2_ref, w3_ref, b3_ref, o_ref):
    # Layer 1: Linear + (Dropout = identity in eval) + Sigmoid
    h1 = jnp.dot(x_ref[...], w1_ref[...], preferred_element_type=jnp.float32)
    a1 = jax.nn.sigmoid(h1 + b1_ref[...])          # b1 is (1, H) -> broadcasts over rows

    # Layer 2: Linear + (Dropout = identity) + Sigmoid
    h2 = jnp.dot(a1.astype(w2_ref.dtype), w2_ref[...], preferred_element_type=jnp.float32)
    a2 = jax.nn.sigmoid(h2 + b2_ref[...])

    # Layer 3: Linear output head
    out = jnp.dot(a2.astype(w3_ref.dtype), w3_ref[...], preferred_element_type=jnp.float32)
    o_ref[...] = (out + b3_ref[...]).astype(o_ref.dtype)


@functools.partial(jax.jit, static_argnames=("tile_b",))
def mlp_forward(x, w1, b1, w2, b2, w3, b3, *, tile_b=512):
    B, n_in = x.shape
    n_h1 = w1.shape[1]
    n_h2 = w2.shape[1]
    n_out = w3.shape[1]

    # Pad to TPU-friendly shapes: features -> multiples of 128 (lane-dense),
    # batch -> multiple of the batch tile (no partial / masked blocks).
    Ni, Nh1, Nh2, No = (_round_up(d, 128) for d in (n_in, n_h1, n_h2, n_out))
    tb = _round_up(min(tile_b, _round_up(B, 8)), 8)
    Bp = _round_up(B, tb)

    xp = jnp.pad(x, ((0, Bp - B), (0, Ni - n_in)))
    w1p = jnp.pad(w1, ((0, Ni - n_in), (0, Nh1 - n_h1)))
    b1p = jnp.pad(b1, ((0, 0), (0, Nh1 - n_h1)))
    w2p = jnp.pad(w2, ((0, Nh1 - n_h1), (0, Nh2 - n_h2)))
    b2p = jnp.pad(b2, ((0, 0), (0, Nh2 - n_h2)))
    w3p = jnp.pad(w3, ((0, Nh2 - n_h2), (0, No - n_out)))
    b3p = jnp.pad(b3, ((0, 0), (0, No - n_out)))

    grid = (Bp // tb,)

    in_specs = [
        pl.BlockSpec((tb, Ni), lambda i: (i, 0)),    # x tile (streamed, double-buffered)
        pl.BlockSpec((Ni, Nh1), lambda i: (0, 0)),   # w1 (constant block -> resident)
        pl.BlockSpec((1, Nh1), lambda i: (0, 0)),    # b1
        pl.BlockSpec((Nh1, Nh2), lambda i: (0, 0)),  # w2
        pl.BlockSpec((1, Nh2), lambda i: (0, 0)),    # b2
        pl.BlockSpec((Nh2, No), lambda i: (0, 0)),   # w3
        pl.BlockSpec((1, No), lambda i: (0, 0)),     # b3
    ]
    out_spec = pl.BlockSpec((tb, No), lambda i: (i, 0))

    # VMEM budget: double-buffered weights + double-buffered x / out tiles +
    # f32 activation scratch + headroom; capped at a v7x-safe 64 MiB.
    wsz = jnp.dtype(w1.dtype).itemsize
    xsz = jnp.dtype(x.dtype).itemsize
    w_bytes = (Ni * Nh1 + Nh1 + Nh1 * Nh2 + Nh2 + Nh2 * No + No) * wsz
    io_bytes = 2 * tb * Ni * xsz + 2 * tb * No * xsz
    act_bytes = 4 * tb * max(Nh1, Nh2) * 4
    need = 2 * w_bytes + io_bytes + act_bytes + (4 << 20)
    vmem_limit = int(min(max(need, 32 << 20), 64 << 20))

    out_p = pl.pallas_call(
        _mlp_kernel,
        out_shape=jax.ShapeDtypeStruct((Bp, No), x.dtype),
        grid_spec=pltpu.PrefetchScalarGridSpec(
            num_scalar_prefetch=0,
            grid=grid,
            in_specs=in_specs,
            out_specs=out_spec,
        ),
        compiler_params=pltpu.CompilerParams(
            dimension_semantics=("parallel",),   # batch axis: shard across TCs on v7x
            vmem_limit_bytes=vmem_limit,
        ),
    )(xp, w1p, b1p, w2p, b2p, w3p, b3p)

    # Strip batch + output-lane padding.
    return out_p[:B, :n_out]


def init_params(key, n_input, n_hidden, n_output, dtype=jnp.float32):
    """Deterministic init mimicking torch.nn.Linear default U(-1/sqrt(fan_in), 1/sqrt(fan_in))."""
    ks = jax.random.split(key, 6)

    def lin(kw, kb, fan_in, fan_out):
        bound = 1.0 / float(fan_in) ** 0.5
        w = jax.random.uniform(kw, (fan_in, fan_out), dtype, -bound, bound)
        b = jax.random.uniform(kb, (1, fan_out), dtype, -bound, bound)
        return w, b

    w1, b1 = lin(ks[0], ks[1], n_input, n_hidden)
    w2, b2 = lin(ks[2], ks[3], n_hidden, n_hidden)
    w3, b3 = lin(ks[4], ks[5], n_hidden, n_output)
    return w1, b1, w2, b2, w3, b3


def reference_forward(x, w1, b1, w2, b2, w3, b3):
    a1 = jax.nn.sigmoid(x @ w1 + b1)
    a2 = jax.nn.sigmoid(a1 @ w2 + b2)
    return a2 @ w3 + b3


if __name__ == "__main__":
    # Small shapes consistent with NNModel(n_input, n_output, n_hidden).
    B, n_input, n_hidden, n_output = 256, 16, 32, 8

    key = jax.random.PRNGKey(0)
    kx, kp = jax.random.split(key)

    x = jax.random.normal(kx, (B, n_input), jnp.float32)
    params = init_params(kp, n_input, n_hidden, n_output)

    # tile_b=128 -> 2 grid steps, exercising the streamed-x / resident-weight pipeline.
    out = mlp_forward(x, *params, tile_b=128)
    out = jax.block_until_ready(out)

    ref = reference_forward(x, *params)
    assert out.shape == (B, n_output), out.shape
    err = float(jnp.max(jnp.abs(out - ref)))
    assert jnp.allclose(out, ref, atol=1e-5, rtol=1e-5), err

    print("KERNEL_OK")
</pallas_src>

<mosaic_0001>
module attributes {stable_mosaic.version = 11 : i64} {
  func.func @_mlp_kernel(%arg0: i32, %arg1: memref<128x128xf32, #tpu.memory_space<vmem>>, %arg2: memref<128x128xf32, #tpu.memory_space<vmem>>, %arg3: memref<1x128xf32, #tpu.memory_space<vmem>>, %arg4: memref<128x128xf32, #tpu.memory_space<vmem>>, %arg5: memref<1x128xf32, #tpu.memory_space<vmem>>, %arg6: memref<128x128xf32, #tpu.memory_space<vmem>>, %arg7: memref<1x128xf32, #tpu.memory_space<vmem>>, %arg8: memref<128x128xf32, #tpu.memory_space<vmem>>) attributes {dimension_semantics = [#tpu.dimension_semantics<parallel>], iteration_bounds = array<i64: 2>, scalar_prefetch = 0 : i64, scratch_operands = 0 : i64, tpu.core_type = #tpu.core_type<tc>, window_params = [{transform_indices = @transform_0, window_bounds = array<i64: 128, 128>}, {pipeline_mode = #tpu.pipeline_mode<synchronous>, transform_indices = @transform_1, window_bounds = array<i64: 128, 128>}, {pipeline_mode = #tpu.pipeline_mode<synchronous>, transform_indices = @transform_2, window_bounds = array<i64: 1, 128>}, {pipeline_mode = #tpu.pipeline_mode<synchronous>, transform_indices = @transform_3, window_bounds = array<i64: 128, 128>}, {pipeline_mode = #tpu.pipeline_mode<synchronous>, transform_indices = @transform_4, window_bounds = array<i64: 1, 128>}, {pipeline_mode = #tpu.pipeline_mode<synchronous>, transform_indices = @transform_5, window_bounds = array<i64: 128, 128>}, {pipeline_mode = #tpu.pipeline_mode<synchronous>, transform_indices = @transform_6, window_bounds = array<i64: 1, 128>}, {transform_indices = @transform_7, window_bounds = array<i64: 128, 128>}]} {
    %c0 = arith.constant 0 : index
    %c0_0 = arith.constant 0 : index
    %0 = vector.load %arg1[%c0, %c0_0] : memref<128x128xf32, #tpu.memory_space<vmem>>, vector<128x128xf32>
    %c0_1 = arith.constant 0 : index
    %c0_2 = arith.constant 0 : index
    %1 = vector.load %arg2[%c0_1, %c0_2] : memref<128x128xf32, #tpu.memory_space<vmem>>, vector<128x128xf32>
    %cst = arith.constant dense<0.000000e+00> : vector<128x128xf32>
    %2 = tpu.matmul %0, %1, %cst {dimension_numbers = #tpu.dot_dimension_numbers<[1], [0], [0], [1], [0, 0, 1, 1], [], []>} : vector<128x128xf32>, vector<128x128xf32>, vector<128x128xf32> -> vector<128x128xf32>
    %c0_3 = arith.constant 0 : index
    %c0_4 = arith.constant 0 : index
    %3 = vector.load %arg3[%c0_3, %c0_4] : memref<1x128xf32, #tpu.memory_space<vmem>>, vector<1x128xf32>
    %4 = vector.broadcast %3 : vector<1x128xf32> to vector<128x128xf32>
    %5 = arith.addf %2, %4 : vector<128x128xf32>
    %6 = arith.negf %5 : vector<128x128xf32>
    %7 = math.exp %6 : vector<128x128xf32>
    %cst_5 = arith.constant 1.000000e+00 : f32
    %8 = vector.broadcast %cst_5 : f32 to vector<128x128xf32>
    %9 = arith.addf %8, %7 : vector<128x128xf32>
    %10 = arith.divf %8, %9 : vector<128x128xf32>
    %c0_6 = arith.constant 0 : index
    %c0_7 = arith.constant 0 : index
    %11 = vector.load %arg4[%c0_6, %c0_7] : memref<128x128xf32, #tpu.memory_space<vmem>>, vector<128x128xf32>
    %cst_8 = arith.constant dense<0.000000e+00> : vector<128x128xf32>
    %12 = tpu.matmul %10, %11, %cst_8 {dimension_numbers = #tpu.dot_dimension_numbers<[1], [0], [0], [1], [0, 0, 1, 1], [], []>} : vector<128x128xf32>, vector<128x128xf32>, vector<128x128xf32> -> vector<128x128xf32>
    %c0_9 = arith.constant 0 : index
    %c0_10 = arith.constant 0 : index
    %13 = vector.load %arg5[%c0_9, %c0_10] : memref<1x128xf32, #tpu.memory_space<vmem>>, vector<1x128xf32>
    %14 = vector.broadcast %13 : vector<1x128xf32> to vector<128x128xf32>
    %15 = arith.addf %12, %14 : vector<128x128xf32>
    %16 = arith.negf %15 : vector<128x128xf32>
    %17 = math.exp %16 : vector<128x128xf32>
    %cst_11 = arith.constant 1.000000e+00 : f32
    %18 = vector.broadcast %cst_11 : f32 to vector<128x128xf32>
    %19 = arith.addf %18, %17 : vector<128x128xf32>
    %20 = arith.divf %18, %19 : vector<128x128xf32>
    %c0_12 = arith.constant 0 : index
    %c0_13 = arith.constant 0 : index
    %21 = vector.load %arg6[%c0_12, %c0_13] : memref<128x128xf32, #tpu.memory_space<vmem>>, vector<128x128xf32>
    %cst_14 = arith.constant dense<0.000000e+00> : vector<128x128xf32>
    %22 = tpu.matmul %20, %21, %cst_14 {dimension_numbers = #tpu.dot_dimension_numbers<[1], [0], [0], [1], [0, 0, 1, 1], [], []>} : vector<128x128xf32>, vector<128x128xf32>, vector<128x128xf32> -> vector<128x128xf32>
    %c0_15 = arith.constant 0 : index
    %c0_16 = arith.constant 0 : index
    %23 = vector.load %arg7[%c0_15, %c0_16] : memref<1x128xf32, #tpu.memory_space<vmem>>, vector<1x128xf32>
    %24 = vector.broadcast %23 : vector<1x128xf32> to vector<128x128xf32>
    %25 = arith.addf %22, %24 : vector<128x128xf32>
    %c0_17 = arith.constant 0 : index
    %c0_18 = arith.constant 0 : index
    %26 = vector.load %arg8[%c0_17, %c0_18] : memref<128x128xf32, #tpu.memory_space<vmem>>, vector<128x128xf32>
    tpu.vector_store %arg8[%c0_17, %c0_18], %25 {strides = array<i32>} : memref<128x128xf32, #tpu.memory_space<vmem>>, vector<128x128xf32>,
    return
  }
  func.func @transform_0(%arg0: i32) -> (i32, i32) {
    %c0_i32 = arith.constant 0 : i32
    %c0_i32_0 = arith.constant 0 : i32
    return %arg0, %c0_i32 : i32, i32
  }
  func.func @transform_1(%arg0: i32) -> (i32, i32) {
    %c0_i32 = arith.constant 0 : i32
    %c0_i32_0 = arith.constant 0 : i32
    %c0_i32_1 = arith.constant 0 : i32
    return %c0_i32, %c0_i32_0 : i32, i32
  }
  func.func @transform_2(%arg0: i32) -> (i32, i32) {
    %c0_i32 = arith.constant 0 : i32
    %c0_i32_0 = arith.constant 0 : i32
    %c0_i32_1 = arith.constant 0 : i32
    return %c0_i32, %c0_i32_0 : i32, i32
  }
  func.func @transform_3(%arg0: i32) -> (i32, i32) {
    %c0_i32 = arith.constant 0 : i32
    %c0_i32_0 = arith.constant 0 : i32
    %c0_i32_1 = arith.constant 0 : i32
    return %c0_i32, %c0_i32_0 : i32, i32
  }
  func.func @transform_4(%arg0: i32) -> (i32, i32) {
    %c0_i32 = arith.constant 0 : i32
    %c0_i32_0 = arith.constant 0 : i32
    %c0_i32_1 = arith.constant 0 : i32
    return %c0_i32, %c0_i32_0 : i32, i32
  }
  func.func @transform_5(%arg0: i32) -> (i32, i32) {
    %c0_i32 = arith.constant 0 : i32
    %c0_i32_0 = arith.constant 0 : i32
    %c0_i32_1 = arith.constant 0 : i32
    return %c0_i32, %c0_i32_0 : i32, i32
  }
  func.func @transform_6(%arg0: i32) -> (i32, i32) {
    %c0_i32 = arith.constant 0 : i32
    %c0_i32_0 = arith.constant 0 : i32
    %c0_i32_1 = arith.constant 0 : i32
    return %c0_i32, %c0_i32_0 : i32, i32
  }
  func.func @transform_7(%arg0: i32) -> (i32, i32) {
    %c0_i32 = arith.constant 0 : i32
    %c0_i32_0 = arith.constant 0 : i32
    return %arg0, %c0_i32 : i32, i32
  }
}

</mosaic_0001>

<bundles_post_ra>
// kernel: mlp_forward.1
= control target key start
LH: loop header
LB: loop body
LE: loop exit
PB: predicated region body
PF: predicated region fallthrough
CT: control target
= control target key end

     0   :  { %s1592_s24 = smov 0   ;;  %s1841_s0 = inlined_call_operand.vmem [shape: f32[256,128], index: 0, kind: input, shape index: {}]   ;;  %s1842_s1 = inlined_call_operand.vmem [shape: f32[128,128], index: 1, kind: input, shape index: {}]   ;;  %s1843_s2 = inlined_call_operand.vmem [shape: f32[1,128], index: 2, kind: input, shape index: {}]   ;;  %s1844_s3 = inlined_call_operand.vmem [shape: f32[128,128], index: 3, kind: input, shape index: {}]   ;;  %s1845_s4 = inlined_call_operand.vmem [shape: f32[1,128], index: 4, kind: input, shape index: {}]   ;;  %s1846_s5 = inlined_call_operand.vmem [shape: f32[128,128], index: 5, kind: input, shape index: {}]   ;;  %s1847_s6 = inlined_call_operand.vmem [shape: f32[1,128], index: 6, kind: input, shape index: {}]   ;;  %s1848_s7 = inlined_call_operand.vmem [shape: f32[256,128], index: 7, kind: output, shape index: {}]  }
   0x1 LB: > { %s1066_s25 = sadd.s32 4294967295, %s1550_s24   ;;  %p1070_p0 = scmp.ge.s32.totalorder %s1550_s24, 1  ;;  %s1550_s24 = sphi %s1592_s24, %s17_s24  }
   0x2   : > { %p238_p1 = scmp.lt.s32.totalorder %s1550_s24, 3 }
   0x4   : > { %p239_p2 = pnand %p1070_p0, %p238_p1 }
   0x5   : > { %s1071_s30 = sshll.u32 (!%p239_p2), %s1066_s25, 4 }
   0x6   : > { %242 = sbr.rel (%p239_p2) target bundleno = 732 (0x2dc), region = 48  ;;  %p271_p3 = scmp.lt.s32.totalorder (!%p239_p2), %s1071_s30, 31 }
   0xb   : > { %v313_v0 = vld [vmem:[%s1842_s1 + $0x78] sm:$0xff]  ;;  %v312_v1 = vld [vmem:[%s1842_s1 + $0x70] sm:$0xff]  ;;  %v311_v2 = vld [vmem:[%s1842_s1 + $0x68] sm:$0xff]  ;;  %s1850_s30 = smov (!%p271_p3, %s1071_s30), 31 }
   0xc   : > { %1208 = vmatprep.subr.mxu0 %v313_v0  ;;  %v310_v3 = vld [vmem:[%s1842_s1 + $0x60] sm:$0xff]  ;;  %s1072_s12 = sshll.u32 %s1850_s30, 3  ;;  %v309_v4 = vld [vmem:[%s1842_s1 + $0x58] sm:$0xff]  ;;  %v308_v6 = vld [vmem:[%s1842_s1 + $0x50] sm:$0xff] }
   0xd   : > { %1209 = vmatpush3.msra.mxu0 %v313_v0  ;;  %s1623_s17 = scalar_lea.vmem %s1841_s0, %s1072_s12  ;;  %v307_v7 = vld [vmem:[%s1842_s1 + $0x48] sm:$0xff]  ;;  %v306_v8 = vld [vmem:[%s1842_s1 + $0x40] sm:$0xff]  ;;  %v305_v9 = vld [vmem:[%s1842_s1 + $0x38] sm:$0xff]  ;;  %s1820_s11 = scalar_lea.vmem %s1848_s7, %s1072_s12 }
   0xe   : > { %1210 = vmatprep.subr.mxu0 %v312_v1  ;;  %v282_v5 = vld [vmem:[%s1623_s17] sm:$0xff]  ;;  %v304_v10 = vld [vmem:[%s1842_s1 + $0x30] sm:$0xff]  ;;  %v303_v11 = vld [vmem:[%s1842_s1 + $0x28] sm:$0xff] }
   0xf   : > { %1211 = vmatpush3.msra.mxu0 %v312_v1  ;;  %1240 = vmatprep.mubr.f32.mxu0 %v282_v5  ;;  %v302_v12 = vld [vmem:[%s1842_s1 + $0x20] sm:$0xff]  ;;  %v301_v13 = vld [vmem:[%s1842_s1 + $0x18] sm:$0xff]  ;;  %v300_v14 = vld [vmem:[%s1842_s1 + $0x10] sm:$0xff] }
  0x10   : > { %1212 = vmatprep.subr.mxu0 %v311_v2  ;;  %v299_v15 = vld [vmem:[%s1842_s1 + $0x8] sm:$0xff]  ;;  %v298_v16 = vld [vmem:[%s1842_s1] sm:$0xff]  ;;  %v284_v18 = vld [vmem:[%s1623_s17 + $0x10] sm:$0xff] }
  0x11   : > { %1213 = vmatpush3.msra.mxu0 %v311_v2  ;;  %v283_v17 = vld [vmem:[%s1623_s17 + $0x8] sm:$0xff]  ;;  %v285_v19 = vld [vmem:[%s1623_s17 + $0x18] sm:$0xff]  ;;  %v286_v20 = vld [vmem:[%s1623_s17 + $0x20] sm:$0xff] }
  0x12   : > { %1214 = vmatprep.subr.mxu0 %v310_v3  ;;  %v287_v21 = vld [vmem:[%s1623_s17 + $0x28] sm:$0xff]  ;;  %v288_v22 = vld [vmem:[%s1623_s17 + $0x30] sm:$0xff]  ;;  %v289_v23 = vld [vmem:[%s1623_s17 + $0x38] sm:$0xff] }
  0x13   : > { %1215 = vmatpush3.msra.mxu0 %v310_v3  ;;  %v290_v24 = vld [vmem:[%s1623_s17 + $0x40] sm:$0xff]  ;;  %v291_v25 = vld [vmem:[%s1623_s17 + $0x48] sm:$0xff]  ;;  %v292_v26 = vld [vmem:[%s1623_s17 + $0x50] sm:$0xff] }
  0x14   : > { %1216 = vmatprep.subr.mxu0 %v309_v4  ;;  %v293_v27 = vld [vmem:[%s1623_s17 + $0x58] sm:$0xff]  ;;  %v294_v28 = vld [vmem:[%s1623_s17 + $0x60] sm:$0xff]  ;;  %v295_v29 = vld [vmem:[%s1623_s17 + $0x68] sm:$0xff] }
  0x15   : > { %1217 = vmatpush3.msra.mxu0 %v309_v4  ;;  %v296_v30 = vld [vmem:[%s1623_s17 + $0x70] sm:$0xff]  ;;  %v297_v31 = vld [vmem:[%s1623_s17 + $0x78] sm:$0xff]  ;;  %v575_v34 = vld [vmem:[%s1844_s3 + $0x68] sm:$0xff] }
  0x16   : > { %1218 = vmatprep.subr.mxu0 %v308_v6  ;;  %v577_v32 = vld [vmem:[%s1844_s3 + $0x78] sm:$0xff]  ;;  %v576_v33 = vld [vmem:[%s1844_s3 + $0x70] sm:$0xff]  ;;  %v574_v35 = vld [vmem:[%s1844_s3 + $0x60] sm:$0xff] }
  0x17   : > { %1219 = vmatpush3.msra.mxu0 %v308_v6  ;;  %1264 = vmatprep.subr.mxu1 %v577_v32  ;;  %v573_v36 = vld [vmem:[%s1844_s3 + $0x58] sm:$0xff]  ;;  %v572_v37 = vld [vmem:[%s1844_s3 + $0x50] sm:$0xff]  ;;  %v571_v38 = vld [vmem:[%s1844_s3 + $0x48] sm:$0xff] }
  0x18   : > { %1220 = vmatprep.subr.mxu0 %v307_v7  ;;  %1265 = vmatpush3.msra.mxu1 %v577_v32  ;;  %v570_v39 = vld [vmem:[%s1844_s3 + $0x40] sm:$0xff]  ;;  %v569_v40 = vld [vmem:[%s1844_s3 + $0x38] sm:$0xff]  ;;  %v568_v41 = vld [vmem:[%s1844_s3 + $0x30] sm:$0xff] }
  0x19   : > { %1221 = vmatpush3.msra.mxu0 %v307_v7  ;;  %1266 = vmatprep.subr.mxu1 %v576_v33  ;;  %v567_v42 = vld [vmem:[%s1844_s3 + $0x28] sm:$0xff]  ;;  %v566_v43 = vld [vmem:[%s1844_s3 + $0x20] sm:$0xff]  ;;  %v565_v44 = vld [vmem:[%s1844_s3 + $0x18] sm:$0xff] }
  0x1a   : > { %1222 = vmatprep.subr.mxu0 %v306_v8  ;;  %1267 = vmatpush3.msra.mxu1 %v576_v33  ;;  %v564_v45 = vld [vmem:[%s1844_s3 + $0x10] sm:$0xff]  ;;  %v563_v46 = vld [vmem:[%s1844_s3 + $0x8] sm:$0xff]  ;;  %v562_v47 = vld [vmem:[%s1844_s3] sm:$0xff] }
  0x1b   : > { %1223 = vmatpush3.msra.mxu0 %v306_v8  ;;  %1268 = vmatprep.subr.mxu1 %v575_v34  ;;  %v1725_v48 = vld [vmem:[%s1843_s2] ss:$0 sm:$0xff] }
  0x1c   : > { %1224 = vmatprep.subr.mxu0 %v305_v9  ;;  %1269 = vmatpush3.msra.mxu1 %v575_v34 }
  0x1d   : > { %1225 = vmatpush3.msra.mxu0 %v305_v9  ;;  %1270 = vmatprep.subr.mxu1 %v574_v35 }
  0x1e   : > { %1226 = vmatprep.subr.mxu0 %v304_v10  ;;  %1271 = vmatpush3.msra.mxu1 %v574_v35 }
  0x1f   : > { %1227 = vmatpush3.msra.mxu0 %v304_v10  ;;  %1272 = vmatprep.subr.mxu1 %v573_v36 }
  0x20   : > { %1228 = vmatprep.subr.mxu0 %v303_v11  ;;  %1273 = vmatpush3.msra.mxu1 %v573_v36 }
  0x21   : > { %1229 = vmatpush3.msra.mxu0 %v303_v11  ;;  %1274 = vmatprep.subr.mxu1 %v572_v37 }
  0x22   : > { %1230 = vmatprep.subr.mxu0 %v302_v12  ;;  %1275 = vmatpush3.msra.mxu1 %v572_v37 }
  0x23   : > { %1231 = vmatpush3.msra.mxu0 %v302_v12  ;;  %1276 = vmatprep.subr.mxu1 %v571_v38 }
  0x24   : > { %1232 = vmatprep.subr.mxu0 %v301_v13  ;;  %1277 = vmatpush3.msra.mxu1 %v571_v38 }
  0x25   : > { %1233 = vmatpush3.msra.mxu0 %v301_v13  ;;  %1278 = vmatprep.subr.mxu1 %v570_v39 }
  0x26   : > { %1234 = vmatprep.subr.mxu0 %v300_v14  ;;  %1279 = vmatpush3.msra.mxu1 %v570_v39 }
  0x27   : > { %1235 = vmatpush3.msra.mxu0 %v300_v14  ;;  %1280 = vmatprep.subr.mxu1 %v569_v40 }
  0x28   : > { %1236 = vmatprep.subr.mxu0 %v299_v15  ;;  %1281 = vmatpush3.msra.mxu1 %v569_v40 }
  0x29   : > { %1237 = vmatpush3.msra.mxu0 %v299_v15  ;;  %1282 = vmatprep.subr.mxu1 %v568_v41 }
  0x2a   : > { %1238 = vmatprep.subr.mxu0 %v298_v16  ;;  %1283 = vmatpush3.msra.mxu1 %v568_v41 }
  0x2b   : > { %1239 = vmatpush3.msra.mxu0 %v298_v16  ;;  %1284 = vmatprep.subr.mxu1 %v567_v42 }
  0x2c   : > { %1241 = vmatmul.mubr.f32.vlgmr.msra.gmra.mxu0 %v283_v17  ;;  %1285 = vmatpush3.msra.mxu1 %v567_v42 }
  0x2d   : > { %1243 = vmatprep.mubr.f32.mxu0 %v284_v18  ;;  %1286 = vmatprep.subr.mxu1 %v566_v43 }
  0x2e   : > { %1287 = vmatpush3.msra.mxu1 %v566_v43 }
  0x2f   : > { %1288 = vmatprep.subr.mxu1 %v565_v44 }
  0x30   : > { %1244 = vmatmul.mubr.f32.gmra.mxu0 %v285_v19  ;;  %1289 = vmatpush3.msra.mxu1 %v565_v44 }
  0x31   : > { %1246 = vmatprep.mubr.f32.mxu0 %v286_v20  ;;  %1290 = vmatprep.subr.mxu1 %v564_v45 }
  0x32   : > { %1291 = vmatpush3.msra.mxu1 %v564_v45 }
  0x33   : > { %1292 = vmatprep.subr.mxu1 %v563_v46 }
  0x34   : > { %1247 = vmatmul.mubr.f32.gmra.mxu0 %v287_v21  ;;  %1293 = vmatpush3.msra.mxu1 %v563_v46 }
  0x35   : > { %1249 = vmatprep.mubr.f32.mxu0 %v288_v22  ;;  %1294 = vmatprep.subr.mxu1 %v562_v47 }
  0x36   : > { %1295 = vmatpush3.msra.mxu1 %v562_v47 }
  0x38   : > { %1250 = vmatmul.mubr.f32.gmra.mxu0 %v289_v23 }
  0x39   : > { %1252 = vmatprep.mubr.f32.mxu0 %v290_v24 }
  0x3c   : > { %1253 = vmatmul.mubr.f32.gmra.mxu0 %v291_v25 }
  0x3d   : > { %1255 = vmatprep.mubr.f32.mxu0 %v292_v26 }
  0x40   : > { %1256 = vmatmul.mubr.f32.gmra.mxu0 %v293_v27 }
  0x41   : > { %1258 = vmatprep.mubr.f32.mxu0 %v294_v28 }
  0x44   : > { %1259 = vmatmul.mubr.f32.gmra.mxu0 %v295_v29 }
  0x45   : > { %1261 = vmatprep.mubr.f32.mxu0 %v296_v30 }
  0x48   : > { %1262 = vmatmul.mubr.f32.gmra.mxu0 %v297_v31 }
  0xec   : > { %v1242_v49 = vpop.f32.mrf.mxu0 }
  0xed   : > { %v393_v50 = vadd.f32 %v1242_v49, %v1725_v48 }
  0xee   : > { %v387_v51 = vpop.f32.mrf.mxu0 }
  0xef   : > { %v1077_v52 = vmul.f32 -1.442695, %v393_v50  ;;  %v388_v53 = vadd.f32 %v1725_v48, %v387_v51 }
  0xf0   : > { %v1245_v54 = vpop.f32.mrf.mxu0 }
  0xf1   : > { %1416 = vpow2.f32 %v1077_v52  ;;  %v1076_v55 = vmul.f32 -1.442695, %v388_v53  ;;  %v403_v56 = vadd.f32 %v1245_v54, %v1725_v48 }
  0xf2   : > { %v397_v57 = vpop.f32.mrf.mxu0 }
  0xf3   : > { %1418 = vpow2.f32 %v1076_v55  ;;  %v1079_v58 = vmul.f32 -1.442695, %v403_v56  ;;  %v398_v59 = vadd.f32 %v1725_v48, %v397_v57 }
  0xf4   : > { %v1248_v60 = vpop.f32.mrf.mxu0 }
  0xf5   : > { %1420 = vpow2.f32 %v1079_v58  ;;  %v1078_v61 = vmul.f32 -1.442695, %v398_v59  ;;  %v413_v62 = vadd.f32 %v1248_v60, %v1725_v48 }
  0xf6   : > { %v407_v63 = vpop.f32.mrf.mxu0 }
  0xf7   : > { %1422 = vpow2.f32 %v1078_v61  ;;  %v1081_v0 = vmul.f32 -1.442695, %v413_v62  ;;  %v408_v1 = vadd.f32 %v1725_v48, %v407_v63 }
  0xf8   : > { %v1251_v2 = vpop.f32.mrf.mxu0 }
  0xf9   : > { %1424 = vpow2.f32 %v1081_v0  ;;  %v1080_v3 = vmul.f32 -1.442695, %v408_v1  ;;  %v423_v4 = vadd.f32 %v1251_v2, %v1725_v48 }
  0xfa   : > { %v417_v5 = vpop.f32.mrf.mxu0 }
  0xfb   : > { %1426 = vpow2.f32 %v1080_v3  ;;  %v1083_v6 = vmul.f32 -1.442695, %v423_v4  ;;  %v418_v7 = vadd.f32 %v1725_v48, %v417_v5 }
  0xfc   : > { %v1254_v8 = vpop.f32.mrf.mxu0 }
  0xfd   : > { %1428 = vpow2.f32 %v1083_v6  ;;  %v1082_v9 = vmul.f32 -1.442695, %v418_v7  ;;  %v433_v10 = vadd.f32 %v1254_v8, %v1725_v48 }
  0xfe   : > { %v1417_v11 = vpop.eup %1416  ;;  %v427_v12 = vpop.f32.mrf.mxu0 }
  0xff   : > { %v515_v13 = vadd.f32 1.0, %v1417_v11  ;;  %1430 = vpow2.f32 %v1082_v9  ;;  %v1085_v14 = vmul.f32 -1.442695, %v433_v10  ;;  %v428_v15 = vadd.f32 %v1725_v48, %v427_v12 }
 0x100   : > { %v1419_v16 = vpop.eup %1418  ;;  %v1257_v17 = vpop.f32.mrf.mxu0 }
 0x101   : > { %1432 = vrcp.f32 %v515_v13  ;;  %v1084_v18 = vmul.f32 -1.442695, %v428_v15  ;;  %v443_v19 = vadd.f32 %v1257_v17, %v1725_v48  ;;  %v514_v20 = vadd.f32 1.0, %v1419_v16  ;;  %v841_v17 = vld [vmem:[%s1846_s5 + $0x78] sm:$0xff] }
 0x102   : > { %v1421_v21 = vpop.eup %1420  ;;  %1434 = vpow2.f32 %v1085_v14  ;;  %v437_v22 = vpop.f32.mrf.mxu0  ;;  %1320 = vmatprep.subr.mxu0 %v841_v17  ;;  %1376 = vmatprep.subr.mxu1 %v841_v17 }
 0x103   : > { %v517_v23 = vadd.f32 1.0, %v1421_v21  ;;  %1436 = vpow2.f32 %v1084_v18  ;;  %v1087_v24 = vmul.f32 -1.442695, %v443_v19  ;;  %v438_v25 = vadd.f32 %v1725_v48, %v437_v22  ;;  %1321 = vmatpush3.msra.mxu0 %v841_v17  ;;  %v840_v18 = vld [vmem:[%s1846_s5 + $0x70] sm:$0xff]  ;;  %v839_v19 = vld [vmem:[%s1846_s5 + $0x68] sm:$0xff]  ;;  %v837_v21 = vld [vmem:[%s1846_s5 + $0x58] sm:$0xff] }
 0x104   : > { %v1423_v26 = vpop.eup %1422  ;;  %v1260_v27 = vpop.f32.mrf.mxu0  ;;  %1438 = vrcp.f32 %v514_v20  ;;  %1322 = vmatprep.subr.mxu0 %v840_v18  ;;  %v838_v20 = vld [vmem:[%s1846_s5 + $0x60] sm:$0xff]  ;;  %v836_v22 = vld [vmem:[%s1846_s5 + $0x50] sm:$0xff] }
 0x105   : > { %1440 = vrcp.f32 %v517_v23  ;;  %v516_v28 = vadd.f32 1.0, %v1423_v26  ;;  %v1086_v29 = vmul.f32 -1.442695, %v438_v25  ;;  %v453_v30 = vadd.f32 %v1260_v27, %v1725_v48  ;;  %1323 = vmatpush3.msra.mxu0 %v840_v18  ;;  %v835_v23 = vld [vmem:[%s1846_s5 + $0x48] sm:$0xff]  ;;  %v833_v25 = vld [vmem:[%s1846_s5 + $0x38] sm:$0xff]  ;;  %v832_v26 = vld [vmem:[%s1846_s5 + $0x30] sm:$0xff] }
 0x106   : > { %v1425_v31 = vpop.eup %1424  ;;  %1442 = vpow2.f32 %v1087_v24  ;;  %v447_v32 = vpop.f32.mrf.mxu0  ;;  %1324 = vmatprep.subr.mxu0 %v839_v19  ;;  %v834_v24 = vld [vmem:[%s1846_s5 + $0x40] sm:$0xff]  ;;  %v831_v27 = vld [vmem:[%s1846_s5 + $0x28] sm:$0xff] }
 0x107   : > { %1444 = vrcp.f32 %v516_v28  ;;  %v1089_v33 = vmul.f32 -1.442695, %v453_v30  ;;  %v448_v34 = vadd.f32 %v1725_v48, %v447_v32  ;;  %v519_v37 = vadd.f32 1.0, %v1425_v31  ;;  %1325 = vmatpush3.msra.mxu0 %v839_v19  ;;  %v830_v28 = vld [vmem:[%s1846_s5 + $0x20] sm:$0xff]  ;;  %v828_v30 = vld [vmem:[%s1846_s5 + $0x10] sm:$0xff]  ;;  %v827_v31 = vld [vmem:[%s1846_s5 + $0x8] sm:$0xff] }
 0x108   : > { %v1427_v35 = vpop.eup %1426  ;;  %1446 = vpow2.f32 %v1086_v29  ;;  %v1263_v36 = vpop.f32.mrf.mxu0  ;;  %1326 = vmatprep.subr.mxu0 %v838_v20  ;;  %v829_v29 = vld [vmem:[%s1846_s5 + $0x18] sm:$0xff]  ;;  %v826_v32 = vld [vmem:[%s1846_s5] sm:$0xff] }
 0x109   : > { %v518_v38 = vadd.f32 1.0, %v1427_v35  ;;  %v1088_v39 = vmul.f32 -1.442695, %v448_v34  ;;  %v463_v40 = vadd.f32 %v1263_v36, %v1725_v48  ;;  %1448 = vpow2.f32 %v1089_v33  ;;  %1327 = vmatpush3.msra.mxu0 %v838_v20  ;;  %v1794_v33 = vld [vmem:[%s1845_s4] ss:$0 sm:$0xff] }
 0x10a   : > { %v1429_v41 = vpop.eup %1428  ;;  %v457_v42 = vpop.f32.mrf.mxu0  ;;  %1328 = vmatprep.subr.mxu0 %v837_v21 }
 0x10b   : > { %1450 = vrcp.f32 %v518_v38  ;;  %v1091_v43 = vmul.f32 -1.442695, %v463_v40  ;;  %v458_v44 = vadd.f32 %v1725_v48, %v457_v42  ;;  %v521_v46 = vadd.f32 1.0, %v1429_v41  ;;  %1329 = vmatpush3.msra.mxu0 %v837_v21 }
 0x10c   : > { %v1431_v45 = vpop.eup %1430  ;;  %1452 = vpow2.f32 %v1088_v39  ;;  %1330 = vmatprep.subr.mxu0 %v836_v22 }
 0x10d   : > { %1454 = vrcp.f32 %v519_v37  ;;  %v520_v47 = vadd.f32 1.0, %v1431_v45  ;;  %v1090_v49 = vmul.f32 -1.442695, %v458_v44  ;;  %1331 = vmatpush3.msra.mxu0 %v836_v22 }
 0x10e   : > { %v1433_v50 = vpop.eup %1432  ;;  %1456 = vpow2.f32 %v1091_v43  ;;  %1332 = vmatprep.subr.mxu0 %v835_v23 }
 0x10f   : > { %v1435_v51 = vpop.eup %1434  ;;  %1458 = vrcp.f32 %v520_v47  ;;  %1333 = vmatpush3.msra.mxu0 %v835_v23 }
 0x110   : > { %v1437_v52 = vpop.eup %1436  ;;  %1460 = vpow2.f32 %v1090_v49  ;;  %v523_v54 = vadd.f32 1.0, %v1435_v51  ;;  %1334 = vmatprep.subr.mxu0 %v834_v24 }
 0x111   : > { %v1439_v53 = vpop.eup %1438  ;;  %1462 = vrcp.f32 %v521_v46  ;;  %v522_v55 = vadd.f32 1.0, %v1437_v52  ;;  %1335 = vmatpush3.msra.mxu0 %v834_v24 }
 0x112   : > { %v1441_v56 = vpop.eup %1440  ;;  %1296 = vmatprep.mubr.f32.mxu1 %v1439_v53  ;;  %1336 = vmatprep.subr.mxu0 %v833_v25 }
 0x113   : > { %v1443_v57 = vpop.eup %1442  ;;  %1464 = vrcp.f32 %v522_v55  ;;  %1297 = vmatmul.mubr.f32.vlgmr.msra.gmra.mxu1 %v1433_v50  ;;  %1337 = vmatpush3.msra.mxu0 %v833_v25 }
 0x114   : > { %v1445_v48 = vpop.eup %1444  ;;  %1466 = vrcp.f32 %v523_v54  ;;  %v525_v59 = vadd.f32 1.0, %v1443_v57  ;;  %1392 = vmatpush3.msra.mxu1 %v841_v17  ;;  %1338 = vmatprep.subr.mxu0 %v832_v26 }
 0x115   : > { %v1447_v58 = vpop.eup %1446  ;;  %1299 = vmatprep.mubr.f32.mxu1 %v1445_v48  ;;  %1377 = vmatprep.subr.mxu1 %v840_v18 }
 0x116   : > { %v524_v60 = vadd.f32 1.0, %v1447_v58  ;;  %v1449_v61 = vpop.eup %1448  ;;  %1393 = vmatpush3.msra.mxu1 %v840_v18  ;;  %1339 = vmatpush3.msra.mxu0 %v832_v26 }
 0x117   : > { %1300 = vmatmul.mubr.f32.gmra.mxu1 %v1441_v56  ;;  %v527_v0 = vadd.f32 1.0, %v1449_v61  ;;  %1378 = vmatprep.subr.mxu1 %v839_v19 }
 0x118   : > { %v1451_v62 = vpop.eup %1450  ;;  %1468 = vrcp.f32 %v524_v60  ;;  %1394 = vmatpush3.msra.mxu1 %v839_v19  ;;  %1340 = vmatprep.subr.mxu0 %v831_v27 }
 0x119   : > { %v1453_v63 = vpop.eup %1452  ;;  %1470 = vrcp.f32 %v525_v59  ;;  %1302 = vmatprep.mubr.f32.mxu1 %v1451_v62  ;;  %1379 = vmatprep.subr.mxu1 %v838_v20 }
 0x11a   : > { %v1455_v1 = vpop.eup %1454  ;;  %v526_v2 = vadd.f32 1.0, %v1453_v63  ;;  %1395 = vmatpush3.msra.mxu1 %v838_v20  ;;  %1341 = vmatpush3.msra.mxu0 %v831_v27 }
 0x11b   : > { %v1457_v3 = vpop.eup %1456  ;;  %1303 = vmatmul.mubr.f32.gmra.mxu1 %v1455_v1  ;;  %1380 = vmatprep.subr.mxu1 %v837_v21 }
 0x11c   : > { %v1459_v4 = vpop.eup %1458  ;;  %1472 = vrcp.f32 %v526_v2  ;;  %v529_v6 = vadd.f32 1.0, %v1457_v3  ;;  %1396 = vmatpush3.msra.mxu1 %v837_v21  ;;  %1342 = vmatprep.subr.mxu0 %v830_v28 }
 0x11d   : > { %v1461_v5 = vpop.eup %1460  ;;  %1474 = vrcp.f32 %v527_v0  ;;  %1305 = vmatprep.mubr.f32.mxu1 %v1459_v4  ;;  %1381 = vmatprep.subr.mxu1 %v836_v22 }
 0x11e   : > { %v1463_v7 = vpop.eup %1462  ;;  %v528_v8 = vadd.f32 1.0, %v1461_v5  ;;  %1397 = vmatpush3.msra.mxu1 %v836_v22  ;;  %1343 = vmatpush3.msra.mxu0 %v830_v28 }
 0x11f   : > { %1306 = vmatmul.mubr.f32.gmra.mxu1 %v1463_v7  ;;  %1382 = vmatprep.subr.mxu1 %v835_v23 }
 0x120   : > { %v1465_v9 = vpop.eup %1464  ;;  %1476 = vrcp.f32 %v528_v8  ;;  %1398 = vmatpush3.msra.mxu1 %v835_v23  ;;  %1344 = vmatprep.subr.mxu0 %v829_v29 }
 0x121   : > { %1478 = vrcp.f32 %v529_v6  ;;  %1308 = vmatprep.mubr.f32.mxu1 %v1465_v9  ;;  %v1467_v10 = vpop.eup %1466  ;;  %1383 = vmatprep.subr.mxu1 %v834_v24 }
 0x122   : > { %1399 = vmatpush3.msra.mxu1 %v834_v24  ;;  %1345 = vmatpush3.msra.mxu0 %v829_v29 }
 0x123   : > { %1309 = vmatmul.mubr.f32.gmra.mxu1 %v1467_v10  ;;  %1384 = vmatprep.subr.mxu1 %v833_v25 }
 0x124   : > { %1400 = vmatpush3.msra.mxu1 %v833_v25  ;;  %1346 = vmatprep.subr.mxu0 %v828_v30 }
 0x125   : > { %v1469_v11 = vpop.eup %1468  ;;  %1385 = vmatprep.subr.mxu1 %v832_v26  ;;  %1347 = vmatpush3.msra.mxu0 %v828_v30 }
 0x126   : > { %v1471_v12 = vpop.eup %1470  ;;  %1311 = vmatprep.mubr.f32.mxu1 %v1469_v11  ;;  %1401 = vmatpush3.msra.mxu1 %v832_v26 }
 0x127   : > { %1312 = vmatmul.mubr.f32.gmra.mxu1 %v1471_v12  ;;  %1386 = vmatprep.subr.mxu1 %v831_v27 }
 0x128   : > { %1402 = vmatpush3.msra.mxu1 %v831_v27  ;;  %1348 = vmatprep.subr.mxu0 %v827_v31 }
 0x129   : > { %v1473_v13 = vpop.eup %1472  ;;  %1387 = vmatprep.subr.mxu1 %v830_v28  ;;  %1349 = vmatpush3.msra.mxu0 %v827_v31 }
 0x12a   : > { %v1475_v14 = vpop.eup %1474  ;;  %1314 = vmatprep.mubr.f32.mxu1 %v1473_v13  ;;  %1403 = vmatpush3.msra.mxu1 %v830_v28 }
 0x12b   : > { %1315 = vmatmul.mubr.f32.gmra.mxu1 %v1475_v14  ;;  %1388 = vmatprep.subr.mxu1 %v829_v29 }
 0x12c   : > { %1404 = vmatpush3.msra.mxu1 %v829_v29  ;;  %1350 = vmatprep.subr.mxu0 %v826_v32 }
 0x12d   : > { %v1477_v15 = vpop.eup %1476  ;;  %1389 = vmatprep.subr.mxu1 %v828_v30  ;;  %1351 = vmatpush3.msra.mxu0 %v826_v32 }
 0x12e   : > { %v1479_v16 = vpop.eup %1478  ;;  %1317 = vmatprep.mubr.f32.mxu1 %v1477_v15  ;;  %1405 = vmatpush3.msra.mxu1 %v828_v30 }
 0x12f   : > { %1318 = vmatmul.mubr.f32.gmra.mxu1 %v1479_v16  ;;  %1390 = vmatprep.subr.mxu1 %v827_v31 }
 0x130   : > { %1406 = vmatpush3.msra.mxu1 %v827_v31 }
 0x131   : > { %1391 = vmatprep.subr.mxu1 %v826_v32 }
 0x132   : > { %1407 = vmatpush3.msra.mxu1 %v826_v32 }
 0x1d3   : > { %v1298_v34 = vpop.f32.mrf.mxu1 }
 0x1d4   : > { %v657_v35 = vadd.f32 %v1298_v34, %v1794_v33 }
 0x1d5   : > { %v651_v36 = vpop.f32.mrf.mxu1 }
 0x1d6   : > { %v1094_v37 = vmul.f32 -1.442695, %v657_v35  ;;  %v652_v38 = vadd.f32 %v1794_v33, %v651_v36 }
 0x1d7   : > { %v1301_v39 = vpop.f32.mrf.mxu1 }
 0x1d8   : > { %1480 = vpow2.f32 %v1094_v37  ;;  %v1093_v40 = vmul.f32 -1.442695, %v652_v38  ;;  %v667_v41 = vadd.f32 %v1301_v39, %v1794_v33 }
 0x1d9   : > { %v661_v42 = vpop.f32.mrf.mxu1 }
 0x1da   : > { %1482 = vpow2.f32 %v1093_v40  ;;  %v1096_v43 = vmul.f32 -1.442695, %v667_v41  ;;  %v662_v44 = vadd.f32 %v1794_v33, %v661_v42 }
 0x1db   : > { %v1304_v45 = vpop.f32.mrf.mxu1 }
 0x1dc   : > { %1484 = vpow2.f32 %v1096_v43  ;;  %v1095_v46 = vmul.f32 -1.442695, %v662_v44  ;;  %v677_v47 = vadd.f32 %v1304_v45, %v1794_v33 }
 0x1dd   : > { %v671_v49 = vpop.f32.mrf.mxu1 }
 0x1de   : > { %1486 = vpow2.f32 %v1095_v46  ;;  %v1098_v50 = vmul.f32 -1.442695, %v677_v47  ;;  %v672_v51 = vadd.f32 %v1794_v33, %v671_v49 }
 0x1df   : > { %v1307_v52 = vpop.f32.mrf.mxu1 }
 0x1e0   : > { %1488 = vpow2.f32 %v1098_v50  ;;  %v1097_v53 = vmul.f32 -1.442695, %v672_v51  ;;  %v687_v54 = vadd.f32 %v1307_v52, %v1794_v33 }
 0x1e1   : > { %v681_v55 = vpop.f32.mrf.mxu1 }
 0x1e2   : > { %1490 = vpow2.f32 %v1097_v53  ;;  %v1100_v56 = vmul.f32 -1.442695, %v687_v54  ;;  %v682_v57 = vadd.f32 %v1794_v33, %v681_v55 }
 0x1e3   : > { %v1310_v48 = vpop.f32.mrf.mxu1 }
 0x1e4   : > { %1492 = vpow2.f32 %v1100_v56  ;;  %v1099_v58 = vmul.f32 -1.442695, %v682_v57  ;;  %v697_v59 = vadd.f32 %v1310_v48, %v1794_v33 }
 0x1e5   : > { %v1481_v60 = vpop.eup %1480  ;;  %v691_v61 = vpop.f32.mrf.mxu1 }
 0x1e6   : > { %v779_v62 = vadd.f32 1.0, %v1481_v60  ;;  %1494 = vpow2.f32 %v1099_v58  ;;  %v1102_v63 = vmul.f32 -1.442695, %v697_v59  ;;  %v692_v0 = vadd.f32 %v1794_v33, %v691_v61 }
 0x1e7   : > { %v1483_v1 = vpop.eup %1482  ;;  %v1313_v2 = vpop.f32.mrf.mxu1 }
 0x1e8   : > { %1496 = vrcp.f32 %v779_v62  ;;  %v778_v3 = vadd.f32 1.0, %v1483_v1  ;;  %v1101_v4 = vmul.f32 -1.442695, %v692_v0  ;;  %v707_v5 = vadd.f32 %v1313_v2, %v1794_v33  ;;  %v1109_v2 = vld [vmem:[%s1847_s6] ss:$0 sm:$0xff] }
 0x1e9   : > { %v1485_v6 = vpop.eup %1484  ;;  %1498 = vpow2.f32 %v1102_v63  ;;  %v701_v7 = vpop.f32.mrf.mxu1 }
 0x1ea   : > { %1500 = vrcp.f32 %v778_v3  ;;  %v781_v8 = vadd.f32 1.0, %v1485_v6  ;;  %v1104_v9 = vmul.f32 -1.442695, %v707_v5  ;;  %v702_v10 = vadd.f32 %v1794_v33, %v701_v7 }
 0x1eb   : > { %v1487_v11 = vpop.eup %1486  ;;  %1502 = vpow2.f32 %v1101_v4  ;;  %v1316_v12 = vpop.f32.mrf.mxu1 }
 0x1ec   : > { %1504 = vrcp.f32 %v781_v8  ;;  %v780_v13 = vadd.f32 1.0, %v1487_v11  ;;  %v1103_v14 = vmul.f32 -1.442695, %v702_v10  ;;  %v717_v15 = vadd.f32 %v1316_v12, %v1794_v33 }
 0x1ed   : > { %v1489_v16 = vpop.eup %1488  ;;  %1506 = vpow2.f32 %v1104_v9  ;;  %v711_v17 = vpop.f32.mrf.mxu1 }
 0x1ee   : > { %1508 = vrcp.f32 %v780_v13  ;;  %v783_v18 = vadd.f32 1.0, %v1489_v16  ;;  %v1106_v19 = vmul.f32 -1.442695, %v717_v15  ;;  %v712_v20 = vadd.f32 %v1794_v33, %v711_v17 }
 0x1ef   : > { %v1491_v21 = vpop.eup %1490  ;;  %1510 = vpow2.f32 %v1103_v14  ;;  %v1319_v22 = vpop.f32.mrf.mxu1 }
 0x1f0   : > { %1512 = vrcp.f32 %v783_v18  ;;  %v782_v23 = vadd.f32 1.0, %v1491_v21  ;;  %v1105_v24 = vmul.f32 -1.442695, %v712_v20  ;;  %v727_v25 = vadd.f32 %v1319_v22, %v1794_v33 }
 0x1f1   : > { %v1493_v26 = vpop.eup %1492  ;;  %1514 = vpow2.f32 %v1106_v19  ;;  %v721_v27 = vpop.f32.mrf.mxu1 }
 0x1f2   : > { %1516 = vrcp.f32 %v782_v23  ;;  %v785_v28 = vadd.f32 1.0, %v1493_v26  ;;  %v1108_v29 = vmul.f32 -1.442695, %v727_v25  ;;  %v722_v30 = vadd.f32 %v1794_v33, %v721_v27 }
 0x1f3   : > { %v1495_v31 = vpop.eup %1494  ;;  %1518 = vpow2.f32 %v1105_v24 }
 0x1f4   : > { %1520 = vrcp.f32 %v785_v28  ;;  %v784_v32 = vadd.f32 1.0, %v1495_v31  ;;  %v1107_v34 = vmul.f32 -1.442695, %v722_v30 }
 0x1f5   : > { %v1497_v35 = vpop.eup %1496  ;;  %1522 = vpow2.f32 %v1108_v29 }
 0x1f6   : > { %v1499_v36 = vpop.eup %1498  ;;  %1524 = vrcp.f32 %v784_v32 }
 0x1f7   : > { %v1501_v37 = vpop.eup %1500  ;;  %1526 = vpow2.f32 %v1107_v34  ;;  %v787_v39 = vadd.f32 1.0, %v1499_v36 }
 0x1f8   : > { %v1503_v38 = vpop.eup %1502  ;;  %1352 = vmatprep.mubr.f32.mxu0 %v1501_v37 }
 0x1f9   : > { %v1505_v40 = vpop.eup %1504  ;;  %v786_v41 = vadd.f32 1.0, %v1503_v38  ;;  %1353 = vmatmul.mubr.f32.vlgmr.msra.gmra.mxu0 %v1497_v35 }
 0x1fa   : > { %v1507_v42 = vpop.eup %1506 }
 0x1fb   : > { %v1509_v43 = vpop.eup %1508  ;;  %1528 = vrcp.f32 %v786_v41  ;;  %v789_v44 = vadd.f32 1.0, %v1507_v42 }
 0x1fc   : > { %v1511_v33 = vpop.eup %1510  ;;  %1530 = vrcp.f32 %v787_v39  ;;  %1355 = vmatprep.mubr.f32.mxu0 %v1509_v43 }
 0x1fd   : > { %v1513_v45 = vpop.eup %1512  ;;  %v788_v46 = vadd.f32 1.0, %v1511_v33  ;;  %1356 = vmatmul.mubr.f32.gmra.mxu0 %v1505_v40 }
 0x1fe   : > { %v1515_v47 = vpop.eup %1514 }
 0x1ff   : > { %v1517_v49 = vpop.eup %1516  ;;  %1532 = vrcp.f32 %v788_v46  ;;  %v791_v51 = vadd.f32 1.0, %v1515_v47 }
 0x200   : > { %v1519_v50 = vpop.eup %1518  ;;  %1534 = vrcp.f32 %v789_v44  ;;  %1358 = vmatprep.mubr.f32.mxu0 %v1517_v49 }
 0x201   : > { %v1521_v52 = vpop.eup %1520  ;;  %v790_v53 = vadd.f32 1.0, %v1519_v50  ;;  %1359 = vmatmul.mubr.f32.gmra.mxu0 %v1513_v45 }
 0x202   : > { %v1523_v54 = vpop.eup %1522 }
 0x203   : > { %v1525_v55 = vpop.eup %1524  ;;  %1536 = vrcp.f32 %v790_v53  ;;  %v793_v57 = vadd.f32 1.0, %v1523_v54 }
 0x204   : > { %v1527_v56 = vpop.eup %1526  ;;  %1538 = vrcp.f32 %v791_v51  ;;  %1361 = vmatprep.mubr.f32.mxu0 %v1525_v55 }
 0x205   : > { %v792_v48 = vadd.f32 1.0, %v1527_v56  ;;  %1362 = vmatmul.mubr.f32.gmra.mxu0 %v1521_v52 }
 0x207   : > { %1540 = vrcp.f32 %v792_v48 }
 0x208   : > { %v1529_v58 = vpop.eup %1528  ;;  %1542 = vrcp.f32 %v793_v57 }
 0x209   : > { %v1531_v59 = vpop.eup %1530  ;;  %1364 = vmatprep.mubr.f32.mxu1 %v1529_v58 }
 0x20a   : > { %1365 = vmatmul.mubr.f32.vlgmr.msra.gmra.mxu1 %v1531_v59 }
 0x20c   : > { %v1533_v60 = vpop.eup %1532 }
 0x20d   : > { %v1535_v61 = vpop.eup %1534  ;;  %1367 = vmatprep.mubr.f32.mxu1 %v1533_v60 }
 0x20e   : > { %1368 = vmatmul.mubr.f32.gmra.mxu1 %v1535_v61 }
 0x210   : > { %v1537_v62 = vpop.eup %1536 }
 0x211   : > { %v1539_v63 = vpop.eup %1538  ;;  %1370 = vmatprep.mubr.f32.mxu1 %v1537_v62 }
 0x212   : > { %1371 = vmatmul.mubr.f32.gmra.mxu1 %v1539_v63 }
 0x214   : > { %v1541_v0 = vpop.eup %1540 }
 0x215   : > { %v1543_v1 = vpop.eup %1542  ;;  %1373 = vmatprep.mubr.f32.mxu1 %v1541_v0 }
 0x216   : > { %1374 = vmatmul.mubr.f32.gmra.mxu1 %v1543_v1 }
 0x2b9   : > { %v1354_v3 = vpop.f32.mrf.mxu0 }
 0x2ba   : > { %v921_v4 = vadd.f32 %v1354_v3, %v1109_v2 }
 0x2bb   : > { %v915_v5 = vpop.f32.mrf.mxu0 }
 0x2bc   : > { %995 = vst [vmem:[%s1820_s11 + $0x8] sm:$0xff] %v921_v4  ;;  %v916_v6 = vadd.f32 %v1109_v2, %v915_v5 }
 0x2bd   : > { %v1357_v7 = vpop.f32.mrf.mxu0 }
 0x2be   : > { %994 = vst [vmem:[%s1820_s11] sm:$0xff] %v916_v6  ;;  %v931_v8 = vadd.f32 %v1357_v7, %v1109_v2 }
 0x2bf   : > { %v925_v9 = vpop.f32.mrf.mxu0 }
 0x2c0   : > { %997 = vst [vmem:[%s1820_s11 + $0x18] sm:$0xff] %v931_v8  ;;  %v926_v10 = vadd.f32 %v1109_v2, %v925_v9 }
 0x2c1   : > { %v1360_v11 = vpop.f32.mrf.mxu0 }
 0x2c2   : > { %996 = vst [vmem:[%s1820_s11 + $0x10] sm:$0xff] %v926_v10  ;;  %v941_v12 = vadd.f32 %v1360_v11, %v1109_v2 }
 0x2c3   : > { %v935_v13 = vpop.f32.mrf.mxu0 }
 0x2c4   : > { %999 = vst [vmem:[%s1820_s11 + $0x28] sm:$0xff] %v941_v12  ;;  %v936_v14 = vadd.f32 %v1109_v2, %v935_v13 }
 0x2c5   : > { %v1363_v15 = vpop.f32.mrf.mxu0 }
 0x2c6   : > { %998 = vst [vmem:[%s1820_s11 + $0x20] sm:$0xff] %v936_v14  ;;  %v951_v16 = vadd.f32 %v1363_v15, %v1109_v2 }
 0x2c7   : > { %v945_v17 = vpop.f32.mrf.mxu0 }
 0x2c8   : > { %1001 = vst [vmem:[%s1820_s11 + $0x38] sm:$0xff] %v951_v16  ;;  %v946_v18 = vadd.f32 %v1109_v2, %v945_v17 }
 0x2ca   : > { %1000 = vst [vmem:[%s1820_s11 + $0x30] sm:$0xff] %v946_v18  ;;  %v1366_v19 = vpop.f32.mrf.mxu1 }
 0x2cb   : > { %v961_v20 = vadd.f32 %v1366_v19, %v1109_v2 }
 0x2cc   : > { %v955_v21 = vpop.f32.mrf.mxu1 }
 0x2cd   : > { %1003 = vst [vmem:[%s1820_s11 + $0x48] sm:$0xff] %v961_v20  ;;  %v956_v22 = vadd.f32 %v1109_v2, %v955_v21 }
 0x2ce   : > { %v1369_v23 = vpop.f32.mrf.mxu1 }
 0x2cf   : > { %1002 = vst [vmem:[%s1820_s11 + $0x40] sm:$0xff] %v956_v22  ;;  %v971_v24 = vadd.f32 %v1369_v23, %v1109_v2 }
 0x2d0   : > { %v965_v25 = vpop.f32.mrf.mxu1 }
 0x2d1   : > { %1005 = vst [vmem:[%s1820_s11 + $0x58] sm:$0xff] %v971_v24  ;;  %v966_v26 = vadd.f32 %v1109_v2, %v965_v25 }
 0x2d2   : > { %v1372_v27 = vpop.f32.mrf.mxu1 }
 0x2d3   : > { %1004 = vst [vmem:[%s1820_s11 + $0x50] sm:$0xff] %v966_v26  ;;  %v981_v28 = vadd.f32 %v1372_v27, %v1109_v2 }
 0x2d4   : > { %v975_v29 = vpop.f32.mrf.mxu1 }
 0x2d5   : > { %1007 = vst [vmem:[%s1820_s11 + $0x68] sm:$0xff] %v981_v28  ;;  %v976_v30 = vadd.f32 %v1109_v2, %v975_v29 }
 0x2d6   : > { %v1375_v31 = vpop.f32.mrf.mxu1 }
 0x2d7   : > { %1006 = vst [vmem:[%s1820_s11 + $0x60] sm:$0xff] %v976_v30  ;;  %v991_v32 = vadd.f32 %v1375_v31, %v1109_v2 }
 0x2d8   : > { %v985_v34 = vpop.f32.mrf.mxu1 }
 0x2d9   : > { %1009 = vst [vmem:[%s1820_s11 + $0x78] sm:$0xff] %v991_v32  ;;  %v986_v35 = vadd.f32 %v1109_v2, %v985_v34 }
 0x2db   : > { %1008 = vst [vmem:[%s1820_s11 + $0x70] sm:$0xff] %v986_v35 }
 0x2dc PF: > { %s17_s24 = sadd.s32 1, %s1550_s24  }
 0x2dd   : > { %p14_p4 = scmp.ge.s32.totalorder %s17_s24, 4  }
 0x2df   :  { %16 = sbr.rel (!%p14_p4) target bundleno = 1 (0x1), region = 78 }

</bundles_post_ra>
